<compile_context>
chip_gen: v7x
topology: tpu7x:2x2x1
jax: 0.10.0
libtpu: 0.0.40
codegen_flags: <defaults>
</compile_context>

<pallas_src>
import functools

import jax
import jax.numpy as jnp
import numpy as np
from jax.experimental import pallas as pl
from jax.experimental.pallas import tpu as pltpu


def _round_up(x, m):
    return (x + m - 1) // m * m


def rgcn_fused_kernel(x_ref, a_ref, w_stack_ref, w_loop_ref, bias_ref, out_ref,
                      *, n_rel, tile_m):
    """One dst-row tile of the fused RelGraphConv layer (no scratch, f32 reg acc).

    x_ref:       (Ns, Dp)      bf16  all node features (resident)
    a_ref:       (R, tm, Ns)   bf16  typed adjacency rows for this dst tile
    w_stack_ref: (R*Dp, Dp)    bf16  per-relation weights stacked along K
    w_loop_ref:  (Dp, Dp)      bf16  self-loop weight (resident)
    bias_ref:    (1, Dp)       f32   (resident)
    out_ref:     (tm, Dp)      f32
    """
    i = pl.program_id(0)
    row0 = pl.multiple_of(i * tile_m, tile_m)
    x_all = x_ref[...]                                  # (Ns, Dp)
    x_tile = x_ref[pl.ds(row0, tile_m), :]              # (tm, Dp) rows of this dst tile

    # self-loop + bias, f32 register accumulator (no VMEM scratch round-trip)
    acc = jnp.dot(x_tile, w_loop_ref[...], preferred_element_type=jnp.float32)
    acc = acc + bias_ref[...]

    # aggregate-first: per-relation neighborhood sums, kept in registers (K = Ns each)
    h_parts = []
    for r in range(n_rel):                              # R is tiny -> fully unrolled
        h_r = jnp.dot(a_ref[r], x_all, preferred_element_type=jnp.float32)   # (tm, Dp)
        # explicit bf16 cast (same rounding points as the previous version)
        h_parts.append(h_r.astype(jnp.bfloat16))

    # ONE wide transform matmul over all relations: K = R*Dp, lane-aligned concat
    h_cat = jnp.concatenate(h_parts, axis=-1)           # (tm, R*Dp) bf16
    acc = acc + jnp.dot(h_cat, w_stack_ref[...], preferred_element_type=jnp.float32)

    out_ref[...] = acc.astype(out_ref.dtype)


def rel_graph_conv_pallas(x, a_typed, w_stack, w_loop, bias, *, tile_m):
    """x: (Ns,Dp) bf16, a_typed: (R,Nd,Ns) bf16, w_stack: (R*Dp,Dp) bf16,
       w_loop: (Dp,Dp) bf16, bias: (Dp,) f32   ->   (Nd, Dp) f32."""
    Ns, Dp = x.shape
    R, Nd, Ns2 = a_typed.shape
    assert Ns2 == Ns and Nd % tile_m == 0 and w_stack.shape == (R * Dp, Dp)
    bias2d = bias.reshape(1, Dp).astype(jnp.float32)
    kernel = functools.partial(rgcn_fused_kernel, n_rel=R, tile_m=tile_m)

    return pl.pallas_call(
        kernel,
        out_shape=jax.ShapeDtypeStruct((Nd, Dp), jnp.float32),
        grid_spec=pltpu.PrefetchScalarGridSpec(
            num_scalar_prefetch=0,
            grid=(Nd // tile_m,),
            in_specs=[
                pl.BlockSpec((Ns, Dp), lambda i: (0, 0)),            # X (resident)
                pl.BlockSpec((R, tile_m, Ns), lambda i: (0, i, 0)),  # A rows, streamed
                pl.BlockSpec((R * Dp, Dp), lambda i: (0, 0)),        # W stacked (resident)
                pl.BlockSpec((Dp, Dp), lambda i: (0, 0)),            # W_loop (resident)
                pl.BlockSpec((1, Dp), lambda i: (0, 0)),             # bias (resident)
            ],
            out_specs=pl.BlockSpec((tile_m, Dp), lambda i: (i, 0)),
        ),
        compiler_params=pltpu.CompilerParams(
            dimension_semantics=("parallel",),          # row axis shards across TCs
            vmem_limit_bytes=64 * 1024 * 1024,
        ),
    )(x, a_typed, w_stack, w_loop, bias2d)


def link_predict_forward(params, node_ids, src, dst, etype, enorm, *, tile_m=16):
    """LinkPredict.forward(g, h, r, norm) -> node representations (N, h_dim)."""
    # EmbeddingLayer: embedding(h.squeeze())  (plain-JAX glue: gather)
    emb = params["embedding"][node_ids.squeeze()]                         # (N, D)
    # basis-regularizer weight composition (glue)
    w_rel = jnp.einsum("rb,bio->rio", params["w_comp"], params["bases"])  # (R, D, D)
    N, D = emb.shape
    R = w_rel.shape[0]

    Dp = _round_up(D, 128)                    # lane-dense feature dim
    Nd = _round_up(N, max(tile_m, 16))        # dst rows: grid/output tiling
    Ns = _round_up(N, 128)                    # src rows: aligned contraction dim

    x = jnp.pad(emb, ((0, Ns - N), (0, Dp - D))).astype(jnp.bfloat16)
    w_pad = jnp.pad(w_rel, ((0, 0), (0, Dp - D), (0, Dp - D)))
    w_stack = w_pad.reshape(R * Dp, Dp).astype(jnp.bfloat16)              # K-stacked W_r
    w_loop = jnp.pad(params["w_loop"], ((0, Dp - D), (0, Dp - D))).astype(jnp.bfloat16)
    bias = jnp.pad(params["bias"], (0, Dp - D))

    # typed adjacency A[r, dst, src] = edge norm   (glue scatter-add)
    a = (jnp.zeros((R, Nd, Ns), jnp.float32)
         .at[etype, dst, src].add(enorm)).astype(jnp.bfloat16)

    out = rel_graph_conv_pallas(x, a, w_stack, w_loop, bias, tile_m=tile_m)
    return out[:N, :D]


if __name__ == "__main__":
    key = jax.random.PRNGKey(0)
    in_dim = 40       # num_nodes  (-> Nd=48: 3 dst-row tiles of tile_m=16, Ns=128)
    h_dim = 32
    num_rels = 4
    num_bases = 2
    R = num_rels * 2  # RGCN uses num_rels * 2 relation types
    E = 120           # number of edges

    ks = jax.random.split(key, 8)
    params = {
        "embedding": jax.random.normal(ks[0], (in_dim, h_dim), jnp.float32),
        "bases": 0.1 * jax.random.normal(ks[1], (num_bases, h_dim, h_dim), jnp.float32),
        "w_comp": jax.random.normal(ks[2], (R, num_bases), jnp.float32),
        "w_loop": 0.1 * jax.random.normal(ks[3], (h_dim, h_dim), jnp.float32),
        "bias": jnp.zeros((h_dim,), jnp.float32),
        # w_relation exists in LinkPredict but is only used by calc_score/get_loss,
        # not by forward(); kept for completeness.
        "w_relation": jax.random.normal(ks[4], (num_rels, h_dim), jnp.float32),
    }

    # inputs: h = node ids (N, 1); graph edges (src, dst, etype); per-edge norm
    node_ids = jnp.arange(in_dim, dtype=jnp.int32).reshape(in_dim, 1)
    src = jax.random.randint(ks[5], (E,), 0, in_dim)
    dst = jax.random.randint(ks[6], (E,), 0, in_dim)
    etype = jax.random.randint(ks[7], (E,), 0, R)
    deg = jnp.zeros((in_dim,), jnp.float32).at[dst].add(1.0)
    enorm = 1.0 / jnp.maximum(deg[dst], 1.0)   # DGL-style 1/in-degree edge norm

    out = link_predict_forward(params, node_ids, src, dst, etype, enorm)
    out = jax.block_until_ready(out)

    # plain-JAX f32 reference (edge-wise message passing) for correctness
    emb = params["embedding"][node_ids.squeeze()]
    w_rel = jnp.einsum("rb,bio->rio", params["w_comp"], params["bases"])
    msg = jnp.einsum("ed,edk->ek", emb[src], w_rel[etype]) * enorm[:, None]
    agg = jnp.zeros((in_dim, h_dim), jnp.float32).at[dst].add(msg)
    ref = agg + emb @ params["w_loop"] + params["bias"][None, :]

    assert out.shape == (in_dim, h_dim) and out.dtype == jnp.float32
    # bf16 operands with f32 MXU accumulation -> loosened tolerance vs f32 reference
    assert np.allclose(np.asarray(out), np.asarray(ref), atol=5e-2, rtol=5e-2)

    # TODO(synk): calc_score / get_loss (BCE + reg) are not part of forward(); not kernelized.
    print("KERNEL_OK")
</pallas_src>

<mosaic_0001>
module attributes {stable_mosaic.version = 11 : i64} {
  func.func @rgcn_fused_kernel(%arg0: i32, %arg1: memref<128x128xbf16, #tpu.memory_space<vmem>>, %arg2: memref<8x16x128xbf16, #tpu.memory_space<vmem>>, %arg3: memref<1024x128xbf16, #tpu.memory_space<vmem>>, %arg4: memref<128x128xbf16, #tpu.memory_space<vmem>>, %arg5: memref<1x128xf32, #tpu.memory_space<vmem>>, %arg6: memref<16x128xf32, #tpu.memory_space<vmem>>) attributes {dimension_semantics = [#tpu.dimension_semantics<parallel>], iteration_bounds = array<i64: 3>, scalar_prefetch = 0 : i64, scratch_operands = 0 : i64, tpu.core_type = #tpu.core_type<tc>, window_params = [{pipeline_mode = #tpu.pipeline_mode<synchronous>, transform_indices = @transform_0, window_bounds = array<i64: 128, 128>}, {transform_indices = @transform_1, window_bounds = array<i64: 8, 16, 128>}, {pipeline_mode = #tpu.pipeline_mode<synchronous>, transform_indices = @transform_2, window_bounds = array<i64: 1024, 128>}, {pipeline_mode = #tpu.pipeline_mode<synchronous>, transform_indices = @transform_3, window_bounds = array<i64: 128, 128>}, {pipeline_mode = #tpu.pipeline_mode<synchronous>, transform_indices = @transform_4, window_bounds = array<i64: 1, 128>}, {transform_indices = @transform_5, window_bounds = array<i64: 16, 128>}]} {
    %c16_i32 = arith.constant 16 : i32
    %0 = arith.muli %arg0, %c16_i32 : i32
    %1 = tpu.assume_multiple %0, 16 : i32
    %c0 = arith.constant 0 : index
    %c0_0 = arith.constant 0 : index
    %2 = vector.load %arg1[%c0, %c0_0] : memref<128x128xbf16, #tpu.memory_space<vmem>>, vector<128x128xbf16>
    %3 = arith.index_cast %1 : i32 to index
    %c0_1 = arith.constant 0 : index
    %4 = vector.load %arg1[%3, %c0_1] : memref<128x128xbf16, #tpu.memory_space<vmem>>, vector<16x128xbf16>
    %c0_2 = arith.constant 0 : index
    %c0_3 = arith.constant 0 : index
    %5 = vector.load %arg4[%c0_2, %c0_3] : memref<128x128xbf16, #tpu.memory_space<vmem>>, vector<128x128xbf16>
    %cst = arith.constant dense<0.000000e+00> : vector<16x128xf32>
    %6 = tpu.matmul %4, %5, %cst {dimension_numbers = #tpu.dot_dimension_numbers<[1], [0], [0], [1], [0, 0, 1, 1], [], []>} : vector<16x128xbf16>, vector<128x128xbf16>, vector<16x128xf32> -> vector<16x128xf32>
    %c0_4 = arith.constant 0 : index
    %c0_5 = arith.constant 0 : index
    %7 = vector.load %arg5[%c0_4, %c0_5] : memref<1x128xf32, #tpu.memory_space<vmem>>, vector<1x128xf32>
    %8 = vector.broadcast %7 : vector<1x128xf32> to vector<16x128xf32>
    %9 = arith.addf %6, %8 : vector<16x128xf32>
    %c0_6 = arith.constant 0 : index
    %c0_7 = arith.constant 0 : index
    %c0_8 = arith.constant 0 : index
    %10 = vector.load %arg2[%c0_6, %c0_7, %c0_8] : memref<8x16x128xbf16, #tpu.memory_space<vmem>>, vector<1x16x128xbf16>
    %11 = vector.shape_cast %10 : vector<1x16x128xbf16> to vector<16x128xbf16>
    %cst_9 = arith.constant dense<0.000000e+00> : vector<16x128xf32>
    %12 = tpu.matmul %11, %2, %cst_9 {dimension_numbers = #tpu.dot_dimension_numbers<[1], [0], [0], [1], [0, 0, 1, 1], [], []>} : vector<16x128xbf16>, vector<128x128xbf16>, vector<16x128xf32> -> vector<16x128xf32>
    %13 = arith.truncf %12 : vector<16x128xf32> to vector<16x128xbf16>
    %c1 = arith.constant 1 : index
    %c0_10 = arith.constant 0 : index
    %c0_11 = arith.constant 0 : index
    %14 = vector.load %arg2[%c1, %c0_10, %c0_11] : memref<8x16x128xbf16, #tpu.memory_space<vmem>>, vector<1x16x128xbf16>
    %15 = vector.shape_cast %14 : vector<1x16x128xbf16> to vector<16x128xbf16>
    %cst_12 = arith.constant dense<0.000000e+00> : vector<16x128xf32>
    %16 = tpu.matmul %15, %2, %cst_12 {dimension_numbers = #tpu.dot_dimension_numbers<[1], [0], [0], [1], [0, 0, 1, 1], [], []>} : vector<16x128xbf16>, vector<128x128xbf16>, vector<16x128xf32> -> vector<16x128xf32>
    %17 = arith.truncf %16 : vector<16x128xf32> to vector<16x128xbf16>
    %c2 = arith.constant 2 : index
    %c0_13 = arith.constant 0 : index
    %c0_14 = arith.constant 0 : index
    %18 = vector.load %arg2[%c2, %c0_13, %c0_14] : memref<8x16x128xbf16, #tpu.memory_space<vmem>>, vector<1x16x128xbf16>
    %19 = vector.shape_cast %18 : vector<1x16x128xbf16> to vector<16x128xbf16>
    %cst_15 = arith.constant dense<0.000000e+00> : vector<16x128xf32>
    %20 = tpu.matmul %19, %2, %cst_15 {dimension_numbers = #tpu.dot_dimension_numbers<[1], [0], [0], [1], [0, 0, 1, 1], [], []>} : vector<16x128xbf16>, vector<128x128xbf16>, vector<16x128xf32> -> vector<16x128xf32>
    %21 = arith.truncf %20 : vector<16x128xf32> to vector<16x128xbf16>
    %c3 = arith.constant 3 : index
    %c0_16 = arith.constant 0 : index
    %c0_17 = arith.constant 0 : index
    %22 = vector.load %arg2[%c3, %c0_16, %c0_17] : memref<8x16x128xbf16, #tpu.memory_space<vmem>>, vector<1x16x128xbf16>
    %23 = vector.shape_cast %22 : vector<1x16x128xbf16> to vector<16x128xbf16>
    %cst_18 = arith.constant dense<0.000000e+00> : vector<16x128xf32>
    %24 = tpu.matmul %23, %2, %cst_18 {dimension_numbers = #tpu.dot_dimension_numbers<[1], [0], [0], [1], [0, 0, 1, 1], [], []>} : vector<16x128xbf16>, vector<128x128xbf16>, vector<16x128xf32> -> vector<16x128xf32>
    %25 = arith.truncf %24 : vector<16x128xf32> to vector<16x128xbf16>
    %c4 = arith.constant 4 : index
    %c0_19 = arith.constant 0 : index
    %c0_20 = arith.constant 0 : index
    %26 = vector.load %arg2[%c4, %c0_19, %c0_20] : memref<8x16x128xbf16, #tpu.memory_space<vmem>>, vector<1x16x128xbf16>
    %27 = vector.shape_cast %26 : vector<1x16x128xbf16> to vector<16x128xbf16>
    %cst_21 = arith.constant dense<0.000000e+00> : vector<16x128xf32>
    %28 = tpu.matmul %27, %2, %cst_21 {dimension_numbers = #tpu.dot_dimension_numbers<[1], [0], [0], [1], [0, 0, 1, 1], [], []>} : vector<16x128xbf16>, vector<128x128xbf16>, vector<16x128xf32> -> vector<16x128xf32>
    %29 = arith.truncf %28 : vector<16x128xf32> to vector<16x128xbf16>
    %c5 = arith.constant 5 : index
    %c0_22 = arith.constant 0 : index
    %c0_23 = arith.constant 0 : index
    %30 = vector.load %arg2[%c5, %c0_22, %c0_23] : memref<8x16x128xbf16, #tpu.memory_space<vmem>>, vector<1x16x128xbf16>
    %31 = vector.shape_cast %30 : vector<1x16x128xbf16> to vector<16x128xbf16>
    %cst_24 = arith.constant dense<0.000000e+00> : vector<16x128xf32>
    %32 = tpu.matmul %31, %2, %cst_24 {dimension_numbers = #tpu.dot_dimension_numbers<[1], [0], [0], [1], [0, 0, 1, 1], [], []>} : vector<16x128xbf16>, vector<128x128xbf16>, vector<16x128xf32> -> vector<16x128xf32>
    %33 = arith.truncf %32 : vector<16x128xf32> to vector<16x128xbf16>
    %c6 = arith.constant 6 : index
    %c0_25 = arith.constant 0 : index
    %c0_26 = arith.constant 0 : index
    %34 = vector.load %arg2[%c6, %c0_25, %c0_26] : memref<8x16x128xbf16, #tpu.memory_space<vmem>>, vector<1x16x128xbf16>
    %35 = vector.shape_cast %34 : vector<1x16x128xbf16> to vector<16x128xbf16>
    %cst_27 = arith.constant dense<0.000000e+00> : vector<16x128xf32>
    %36 = tpu.matmul %35, %2, %cst_27 {dimension_numbers = #tpu.dot_dimension_numbers<[1], [0], [0], [1], [0, 0, 1, 1], [], []>} : vector<16x128xbf16>, vector<128x128xbf16>, vector<16x128xf32> -> vector<16x128xf32>
    %37 = arith.truncf %36 : vector<16x128xf32> to vector<16x128xbf16>
    %c7 = arith.constant 7 : index
    %c0_28 = arith.constant 0 : index
    %c0_29 = arith.constant 0 : index
    %38 = vector.load %arg2[%c7, %c0_28, %c0_29] : memref<8x16x128xbf16, #tpu.memory_space<vmem>>, vector<1x16x128xbf16>
    %39 = vector.shape_cast %38 : vector<1x16x128xbf16> to vector<16x128xbf16>
    %cst_30 = arith.constant dense<0.000000e+00> : vector<16x128xf32>
    %40 = tpu.matmul %39, %2, %cst_30 {dimension_numbers = #tpu.dot_dimension_numbers<[1], [0], [0], [1], [0, 0, 1, 1], [], []>} : vector<16x128xbf16>, vector<128x128xbf16>, vector<16x128xf32> -> vector<16x128xf32>
    %41 = arith.truncf %40 : vector<16x128xf32> to vector<16x128xbf16>
    %42 = tpu.concatenate %13, %17, %21, %25, %29, %33, %37, %41 in 1 : vector<16x128xbf16>, vector<16x128xbf16>, vector<16x128xbf16>, vector<16x128xbf16>, vector<16x128xbf16>, vector<16x128xbf16>, vector<16x128xbf16>, vector<16x128xbf16> -> vector<16x1024xbf16>
    %c0_31 = arith.constant 0 : index
    %c0_32 = arith.constant 0 : index
    %43 = vector.load %arg3[%c0_31, %c0_32] : memref<1024x128xbf16, #tpu.memory_space<vmem>>, vector<1024x128xbf16>
    %cst_33 = arith.constant dense<0.000000e+00> : vector<16x128xf32>
    %44 = tpu.matmul %42, %43, %cst_33 {dimension_numbers = #tpu.dot_dimension_numbers<[1], [0], [0], [1], [0, 0, 1, 1], [], []>} : vector<16x1024xbf16>, vector<1024x128xbf16>, vector<16x128xf32> -> vector<16x128xf32>
    %45 = arith.addf %9, %44 : vector<16x128xf32>
    %c0_34 = arith.constant 0 : index
    %c0_35 = arith.constant 0 : index
    %46 = vector.load %arg6[%c0_34, %c0_35] : memref<16x128xf32, #tpu.memory_space<vmem>>, vector<16x128xf32>
    tpu.vector_store %arg6[%c0_34, %c0_35], %45 {strides = array<i32>} : memref<16x128xf32, #tpu.memory_space<vmem>>, vector<16x128xf32>,
    return
  }
  func.func @transform_0(%arg0: i32) -> (i32, i32) {
    %c0_i32 = arith.constant 0 : i32
    %c0_i32_0 = arith.constant 0 : i32
    %c0_i32_1 = arith.constant 0 : i32
    return %c0_i32, %c0_i32_0 : i32, i32
  }
  func.func @transform_1(%arg0: i32) -> (i32, i32, i32) {
    %c0_i32 = arith.constant 0 : i32
    %c0_i32_0 = arith.constant 0 : i32
    %c0_i32_1 = arith.constant 0 : i32
    return %c0_i32, %arg0, %c0_i32_0 : i32, i32, i32
  }
  func.func @transform_2(%arg0: i32) -> (i32, i32) {
    %c0_i32 = arith.constant 0 : i32
    %c0_i32_0 = arith.constant 0 : i32
    %c0_i32_1 = arith.constant 0 : i32
    return %c0_i32, %c0_i32_0 : i32, i32
  }
  func.func @transform_3(%arg0: i32) -> (i32, i32) {
    %c0_i32 = arith.constant 0 : i32
    %c0_i32_0 = arith.constant 0 : i32
    %c0_i32_1 = arith.constant 0 : i32
    return %c0_i32, %c0_i32_0 : i32, i32
  }
  func.func @transform_4(%arg0: i32) -> (i32, i32) {
    %c0_i32 = arith.constant 0 : i32
    %c0_i32_0 = arith.constant 0 : i32
    %c0_i32_1 = arith.constant 0 : i32
    return %c0_i32, %c0_i32_0 : i32, i32
  }
  func.func @transform_5(%arg0: i32) -> (i32, i32) {
    %c0_i32 = arith.constant 0 : i32
    %c0_i32_0 = arith.constant 0 : i32
    return %arg0, %c0_i32 : i32, i32
  }
}

</mosaic_0001>

<bundles_post_ra>
// kernel: tpu_custom_call.1
= control target key start
LH: loop header
LB: loop body
LE: loop exit
PB: predicated region body
PF: predicated region fallthrough
CT: control target
= control target key end

     0   :  { %s3091_s0 = inlined_call_operand.hbm [shape: bf16[128,128], index: 0, kind: input, shape index: {}]   ;;  %s3092_s1 = inlined_call_operand.hbm [shape: bf16[8,48,128], index: 1, kind: input, shape index: {}]   ;;  %s3093_s2 = inlined_call_operand.hbm [shape: bf16[1024,128], index: 2, kind: input, shape index: {}]   ;;  %s3094_s3 = inlined_call_operand.hbm [shape: bf16[128,128], index: 3, kind: input, shape index: {}]   ;;  %s3095_s4 = inlined_call_operand.hbm [shape: f32[1,128], index: 4, kind: input, shape index: {}]   ;;  %s3096_s5 = inlined_call_operand.hbm [shape: f32[48,128], index: 5, kind: output, shape index: {}]  }
   0x1   :  { %3105 = sst [smem:[#allocation23_spill]] %s3094_s3 }
   0x2   :  { %10 = vsyncpa [#allocation3], 0 }
   0x3   :  { %11 = vsyncpa [#allocation6], 0 }
   0x4   :  { %13 = vsyncpa [#allocation6 + $0x1], 0 }
   0x5   :  { %14 = vsyncpa [#allocation9], 0 }
   0x6   :  { %15 = vsyncpa [#allocation4], 0 }
   0x7   :  { %17 = vsyncpa [#allocation4 + $0x1], 0  ;;  %s2642_s18 = smov 0   ;;  %s2644_s19 = smov 0  }
   0x8   :  { %s2646_s20 = smov 0   ;;  %s2648_s21 = smov 0  }
   0x9 LB: > { %s2663_s22 = sadd.s32 4294967295, %s2593_s21   ;;  %s1732_s23 = sadd.s32 4294967294, %s2593_s21   ;;  %s2593_s21 = sphi %s2648_s21, %s3129_s21   ;;  %s2589_s20 = sphi %s2646_s20, %s3133_s20   ;;  %s2585_s19 = sphi %s2644_s19, %s3132_s19   ;;  %s2581_s18 = sphi %s2642_s18, %s3131_s18  }
   0xa   : > { %s2667_s24 = sadd.s32 1, %s2593_s21   ;;  %s51_s25 = sadd.s32 1, %s2589_s20 }
   0xb   : > { %3106 = sst [smem:[#allocation20_spill]] %s2667_s24  ;;  %s48_s26 = ssub.s32 %s2593_s21, %s2667_s24 }
   0xc   : > { %p58_p0 = scmp.ne.s32.totalorder %s2589_s20, %s2585_s19  ;;  %p49_p1 = scmp.eq.s32.totalorder %s48_s26, 0 }
   0xd   : > { %p59_p2 = scmp.eq.s32.totalorder %s2593_s21, 0  ;;  %p64_p3 = scmp.ne.s32.totalorder %s2585_s19, %s2581_s18 }
   0xe   : > { %p3097_p4 = scmp.eq.s32.totalorder %s2663_s22, 0  ;;  %p151_p7 = scmp.eq.s32.totalorder %s2663_s22, 2 }
   0xf   : > { %s2679_s27 = scalar_select %p49_p1, %s2589_s20, %s51_s25  }
  0x10   : > { %p2681_p5 = por %p59_p2, %p58_p0  ;;  %p2687_p6 = por %p3097_p4, %p64_p3 }
  0x11   : > { %3107 = sst [smem:[#allocation21_spill]] %s2679_s27  ;;  %p157_p8 = scmp.eq.s32.totalorder %s1732_s23, 2 }
  0x12   : > { %s3108_s28 = scalar_select %p2681_p5, 1, 0 }
  0x13   : > { %s3109_s29 = scalar_select %p2687_p6, 1, 0 }
  0x14   : > { %p1733_p9 = scmp.ge.s32.totalorder %s2593_s21, 1  ;;  %p164_p10 = scmp.lt.s32.totalorder %s2593_s21, 4 }
  0x15   : > { %p2694_p11 = por %p151_p7, %p58_p0  ;;  %p2698_p12 = por %p157_p8, %p64_p3 }
  0x16   : > { %p2702_p13 = pnand %p1733_p9, %p164_p10  ;;  %s2595_s8 = smov [#allocation8]  }
  0x17   : > { %s3110_s30 = scalar_select %p2694_p11, 1, 0 }
  0x18   : > { %s3111_s6 = scalar_select %p2698_p12, 1, 0 }
  0x19   : > { %s3113_s7 = scalar_select %p2702_p13, 1, 0 }
  0x1a   : > { %3112 = sst [smem:[#allocation22_spill]] %s3111_s6  ;;  %p2240_p1 = pneg %p2702_p13 }
  0x1b   : > { %s202_s9 = sshll.u32 %s2595_s8, 4  ;;  %s2596_s11 = smov [#allocation2]   ;;  %s203_s9 = int_to_ptr.vmem [resolvable:$true] %s202_s9 }
  0x1c   : > { %p2710_p2 = pnand %p2240_p1, %p3097_p4  ;;  %s176_s12 = sshll.u32 %s2596_s11, 4  ;;  %s2714_s12 = int_to_ptr.vmem [resolvable:$true] %s176_s12 }
  0x1d   : > { %s3115_s3 = sld [smem:[#allocation23_spill]] }
  0x1e   : > { %p2724_p3 = pneg %p2710_p2 }
  0x23   : > { %s2403_s15 = scalar_lea.hbm %s3115_s3, 1024 }
  0x24   : > { %p2404_p0 = scmp.ne.s32.totalorder %s3115_s3, %s2403_s15  ;;  %p2410_p9 = scmp.lt.u32.totalorder %s2403_s15, %s3115_s3 }
  0x26   : > { %p2406_p7 = pnand %p2724_p3, %p2404_p0 }
  0x28   : > { %p2407_p8 = pneg %p2406_p7 }
  0x2a   : > { %p2412_p10 = pnand %p2410_p9, %p2407_p8 }
  0x2c   : > { %2415 = shalt.err (!%p2412_p10)
}
  0x2d   : > { %s2416_s8 = scalar_lea.vmem %s203_s9, 1024  ;;  %p2424_p11 = scmp.lt.s32.totalorder %s203_s9, %s203_s9 }
  0x2e   : > { %p2417_p1 = scmp.ne.s32.totalorder %s203_s9, %s2416_s8  ;;  %p2425_p6 = scmp.lt.s32.totalorder %s2416_s8, %s2416_s8 }
  0x30   : > { %p2419_p4 = pnand %p2417_p1, %p2724_p3  ;;  %p2426_p13 = por %p2425_p6, %p2424_p11 }
  0x32   : > { %p2420_p12 = pneg %p2419_p4 }
  0x34   : > { %p2427_p5 = pnand %p2426_p13, %p2420_p12 }
  0x36   : > { %2430 = shalt.err (!%p2427_p5)
}
  0x37   : > { %s2597_s11 = smov 64   ;;  %s2598_s13 = smov 4  }
  0x38   : > { %2249 = dma.hbm_to_vmem [thread:$0]  (!%p2710_p2), %s3115_s3, 1024, %s203_s9, [#allocation9], %s2597_s11, %s2597_s11, %s2598_s13  }
  0x39   : > { %s2431_s25 = scalar_lea.hbm %s3091_s0, 1024 }
  0x3a   : > { %p2432_p4 = scmp.ne.s32.totalorder %s3091_s0, %s2431_s25  ;;  %p2438_p11 = scmp.lt.u32.totalorder %s2431_s25, %s3091_s0 }
  0x3c   : > { %p2434_p5 = pnand %p2432_p4, %p2724_p3 }
  0x3e   : > { %p2435_p6 = pneg %p2434_p5 }
  0x40   : > { %p2440_p12 = pnand %p2438_p11, %p2435_p6 }
  0x42   : > { %2443 = shalt.err (!%p2440_p12)
}
  0x43   : > { %s2444_s9 = scalar_lea.vmem %s2714_s12, 1024  ;;  %p2452_p8 = scmp.lt.s32.totalorder %s2714_s12, %s2714_s12 }
  0x44   : > { %p2445_p13 = scmp.ne.s32.totalorder %s2714_s12, %s2444_s9  ;;  %p2453_p9 = scmp.lt.s32.totalorder %s2444_s9, %s2444_s9 }
  0x46   : > { %p2447_p0 = pnand %p2445_p13, %p2724_p3  ;;  %p2454_p10 = por %p2453_p9, %p2452_p8 }
  0x48   : > { %p2448_p7 = pneg %p2447_p0 }
  0x4a   : > { %p2455_p1 = pnand %p2454_p10, %p2448_p7 }
  0x4c   : > { %2458 = shalt.err (!%p2455_p1)
}
  0x4d   : > { %2243 = dma.hbm_to_vmem [thread:$0]  (!%p2710_p2), %s3091_s0, 1024, %s2714_s12, [#allocation3], %s2597_s11, %s2597_s11, %s2598_s13  }
  0x4e   : > { %s2599_s14 = smov [#allocation7]   ;;  %s2600_s16 = smov [#allocation10]  }
  0x4f   : > { %s189_s15 = sshll.u32 %s2599_s14, 4  ;;  %s216_s17 = sshll.u32 %s2600_s16, 4  ;;  %s190_s15 = int_to_ptr.vmem [resolvable:$true] %s189_s15  ;;  %s217_s17 = int_to_ptr.vmem [resolvable:$true] %s216_s17 }
  0x50   : > { %s2459_s8 = scalar_lea.hbm %s3093_s2, 8192 }
  0x51   : > { %p2460_p4 = scmp.ne.s32.totalorder %s3093_s2, %s2459_s8  ;;  %p2466_p11 = scmp.lt.u32.totalorder %s2459_s8, %s3093_s2 }
  0x53   : > { %p2462_p5 = pnand %p2460_p4, %p2724_p3 }
  0x55   : > { %p2463_p6 = pneg %p2462_p5 }
  0x57   : > { %p2468_p12 = pnand %p2466_p11, %p2463_p6 }
  0x59   : > { %2471 = shalt.err (!%p2468_p12)
}
  0x5a   : > { %s2472_s12 = scalar_lea.vmem %s190_s15, 8192  ;;  %p2480_p8 = scmp.lt.s32.totalorder %s190_s15, %s190_s15 }
  0x5b   : > { %p2473_p13 = scmp.ne.s32.totalorder %s190_s15, %s2472_s12  ;;  %p2481_p9 = scmp.lt.s32.totalorder %s2472_s12, %s2472_s12 }
  0x5d   : > { %p2475_p0 = pnand %p2473_p13, %p2724_p3  ;;  %p2482_p10 = por %p2481_p9, %p2480_p8 }
  0x5f   : > { %p2476_p7 = pneg %p2475_p0 }
  0x61   : > { %p2483_p1 = pnand %p2482_p10, %p2476_p7 }
  0x63   : > { %2486 = shalt.err (!%p2483_p1)
}
  0x64   : > { %2246 = dma.hbm_to_vmem [thread:$0]  (!%p2710_p2), %s3093_s2, 8192, %s190_s15, [#allocation6], %s2597_s11, %s2597_s11, %s2598_s13  }
  0x65   : > { %s2487_s16 = scalar_lea.hbm %s3095_s4, 16 }
  0x66   : > { %p2488_p4 = scmp.ne.s32.totalorder %s3095_s4, %s2487_s16  ;;  %p2494_p11 = scmp.lt.u32.totalorder %s2487_s16, %s3095_s4 }
  0x68   : > { %p2490_p5 = pnand %p2488_p4, %p2724_p3 }
  0x6a   : > { %p2491_p6 = pneg %p2490_p5 }
  0x6c   : > { %p2496_p12 = pnand %p2494_p11, %p2491_p6 }
  0x6e   : > { %2499 = shalt.err (!%p2496_p12)
}
  0x6f   : > { %s2500_s24 = scalar_lea.vmem %s217_s17, 16  ;;  %s2507_s11 = scalar_lea.vmem %s217_s17, 32 }
  0x70   : > { %p2501_p13 = scmp.ne.s32.totalorder %s217_s17, %s2500_s24  ;;  %p2508_p8 = scmp.lt.s32.totalorder %s217_s17, %s217_s17 }
  0x71   : > { %p2509_p9 = scmp.lt.s32.totalorder %s2507_s11, %s2500_s24 }
  0x72   : > { %p2503_p0 = pnand %p2501_p13, %p2724_p3 }
  0x73   : > { %p2510_p10 = por %p2509_p9, %p2508_p8 }
  0x74   : > { %p2504_p7 = pneg %p2503_p0 }
  0x76   : > { %p2511_p1 = pnand %p2510_p10, %p2504_p7 }
  0x78   : > { %2514 = shalt.err (!%p2511_p1)
}
  0x79   : > { %2252 = dma.hbm_to_vmem [thread:$0]  (!%p2710_p2), %s3095_s4, 16, %s217_s17, [#allocation9]  }
  0x7a   : > { %p1738_p4 = scmp.ge.s32.totalorder %s2593_s21, 3 }
  0x7c   : > { %223 = sbr.rel (%p1738_p4) target bundleno = 146 (0x92), region = 32 }
  0x83   : > { %s227_s23 = sand.u32 1, %s2593_s21   ;;  %s229_s12 = sand.u32 1, %s2589_s20  }
  0x84   : > { %s1739_s3 = sshll.u32 %s229_s12, 6  ;;  %s1862_s10 = sshll.u32 %s2593_s21, 7 }
  0x85   : > { %s237_s17 = scalar_lea.hbm %s3092_s1, %s1862_s10  ;;  %p3117_p2 = scmp.ne.s32.totalorder %s3108_s28, 0 }
  0x86   : > { %s231_s16 = scalar_lea.vmem [#allocation5], %s1739_s3  ;;  %s2601_s8 = smov 384  }
  0x87   : > { %s2221_s14 = scalar_select %p3117_p2, [#allocation0], [#allocation14] }
  0x88   : > { %s250_s25 = sshll.u32 %s231_s16, 4  ;;  %2222 = sst [smem:[#allocation13]] (%p3117_p2), %s2601_s8  ;;  %s251_s25 = int_to_ptr.vmem [resolvable:$true] %s250_s25 }
  0x89   : > { %s242_s26 = sld [smem:[%s2221_s14]]   ;;  %s2602_s9 = smov 128  }
  0x8a   : > { %2223 = sst [smem:[#allocation13 + $0x1]] (%p3117_p2), %s2602_s9  ;;  %s2603_s24 = smov 2  }
  0x8b   : > { %2224 = sst [smem:[#allocation13 + $0x2]] (%p3117_p2), %s2603_s24  ;;  %s2604_s11 = smov 64  }
  0x8c   : > { %2225 = sst [smem:[#allocation13 + $0x3]] (%p3117_p2), %s2604_s11  ;;  %s2605_s15 = smov 4  }
  0x8d   : > { %2226 = sst [smem:[#allocation13 + $0x4]] (%p3117_p2), %s2604_s11  ;;  %s228_s3 = scalar_lea.sflag [#allocation6], %s227_s23 }
  0x8e   : > { %2227 = sst [smem:[#allocation13 + $0x5]] (%p3117_p2), %s2605_s15  ;;  %s2606_s10 = smov [#allocation12]  }
  0x8f   : > { %s1742_s13 = sshll.u32 %s242_s26, 26 }
  0x90   : > { %s1743_s12 = sadd.s32 134217728, %s1742_s13 }
  0x91   : > { %2228 = dma.general (%p3117_p2), %s237_s17, 1024, %s251_s25, %s228_s3, %s2606_s10, [#allocation13], %s1743_s12, 0  }
  0x92 PF: > { %p3118_p3 = scmp.ne.s32.totalorder %s3113_s7, 0 }
  0x93   : > { %p3119_p5 = scmp.eq.s32.totalorder (!%p3118_p3), %s2663_s22, 0 }
  0x94   : > { %275 = sbr.rel (%p3118_p3) target bundleno = 782 (0x30e), region = 40 }
  0x9b   : > { %2560 = dma.done.wait (%p3119_p5), [#allocation3], 1024   ;;  %p3120_p6 = pmov %p3119_p5 }
  0x9c   : > { %s281_s6 = sand.u32 1, %s2663_s22   ;;  %s2839_s27 = sand.u32 1, %s2585_s19  }
  0x9d   : > { %2562 = vsyncadd (%p3120_p6), [#allocation3], 4294966272  ;;  %s1746_s23 = sshll.u32 %s2839_s27, 6  ;;  %s282_s28 = scalar_lea.sflag [#allocation6], %s281_s6 }
  0x9e   : > { %s2842_s17 = scalar_lea.vmem [#allocation5], %s1746_s23  ;;  %p3121_p11 = scmp.ne.s32.totalorder %s3109_s29, 0 }
  0xa0   : > { %2564 = dma.done.wait (%p3121_p11), %s282_s28, 1024  }
  0xa1   : > { %2566 = vsyncadd (%p3121_p11), %s282_s28, 4294966272  ;;  %p3122_p12 = pmov %p3119_p5 }
  0xa2   : > { %p3123_p13 = pmov %p3119_p5 }
  0xa3   : > { %2568 = dma.done.wait (%p3122_p12), [#allocation6], 8192  }
  0xa4   : > { %2570 = vsyncadd (%p3123_p13), [#allocation6], 4294959104  ;;  %p3124_p0 = pmov %p3119_p5 }
  0xa6   : > { %2572 = dma.done.wait (%p3124_p0), [#allocation9], 1040   ;;  %p3125_p7 = pmov %p3124_p0 }
  0xa7   : > { %v2607_v0 = vmov 0.0   ;;  %vm2608_vm0 = vmmov 0   ;;  %s1751_s29 = sshll.u32 %s2663_s22, 4  ;;  %v2314_v1 = vld [vmem:[#allocation8] sm:$0xff]   ;;  %v2315_v2 = vld [vmem:[#allocation8 + $0x8] sm:$0xff]   ;;  %v2316_v3 = vld [vmem:[#allocation8 + $0x10] sm:$0xff]  }
  0xa8   : > { %2574 = vsyncadd (%p3125_p7), [#allocation9], 4294966256  ;;  %2033 = vmatprep.subr.bf16.mxu0 %v2607_v0  ;;  %2053 = vmatprep.subr.bf16.mxu1 %v2607_v0  ;;  %s344_s7 = sshra.s32 %s1751_s29, 3  ;;  %v2865_v4 = vld [vmem:[#allocation2] sm:$0xff]   ;;  %v2317_v5 = vld [vmem:[#allocation8 + $0x18] sm:$0xff]   ;;  %s1750_s25 = sshll.u32 %s2839_s27, 4 }
  0xa9   : > { %2049 = vmatprep.mubr.msk.bf16.mxu0 %vm2608_vm0, %v2607_v0  ;;  %2069 = vmatprep.mubr.msk.bf16.mxu1 %vm2608_vm0, %v2607_v0  ;;  %s1752_s14 = sshll.u32 %s344_s7, 2  ;;  %v2868_v6 = vld [vmem:[#allocation2 + $0x8] sm:$0xff]   ;;  %v2318_v7 = vld [vmem:[#allocation8 + $0x20] sm:$0xff]   ;;  %v2873_v8 = vld [vmem:[#allocation2 + $0x10] sm:$0xff]   ;;  %s323_s26 = scalar_lea.vmem [#allocation11], %s1750_s25 }
  0xaa   : > { %2034 = vmatpush3.bf16.msra.mxu0 %v2314_v1  ;;  %s347_s16 = scalar_lea.vmem [#allocation2], %s1752_s14  ;;  %2054 = vmatpush3.bf16.msra.mxu1 %v2865_v4  ;;  %v2319_v9 = vld [vmem:[#allocation8 + $0x28] sm:$0xff]   ;;  %v2878_v10 = vld [vmem:[#allocation2 + $0x18] sm:$0xff]   ;;  %v2320_v11 = vld [vmem:[#allocation8 + $0x30] sm:$0xff]   ;;  %s1617_s8 = sshll.u32 %s323_s26, 4  ;;  %s3043_s8 = int_to_ptr.vmem [resolvable:$true] %s1617_s8 }
  0xab   : > { %2035 = vmatprep.subr.bf16.mxu0 %v2607_v0  ;;  %2055 = vmatprep.subr.bf16.mxu1 %v2607_v0  ;;  %v2883_v12 = vld [vmem:[#allocation2 + $0x20] sm:$0xff]   ;;  %v2321_v13 = vld [vmem:[#allocation8 + $0x38] sm:$0xff]   ;;  %v2887_v14 = vld [vmem:[#allocation2 + $0x28] sm:$0xff]   ;;  %s1863_s9 = sshll.u32 %s2663_s22, 8  ;;  %s1604_s15 = scalar_lea.sflag [#allocation4], %s2839_s27 }
  0xac   : > { %v2323_v15 = vld [vmem:[%s347_s16] sm:$0xff]   ;;  %v2893_v16 = vld [vmem:[#allocation2 + $0x30] sm:$0xff]   ;;  %v2897_v17 = vld [vmem:[#allocation2 + $0x38] sm:$0xff]   ;;  %s3048_s13 = scalar_lea.hbm %s3096_s5, %s1863_s9  ;;  %s2515_s12 = scalar_lea.vmem %s3043_s8, 256 }
  0xad   : > { %v2331_v18 = vld [vmem:[%s2842_s17] sm:$0xff]   ;;  %v2332_v19 = vld [vmem:[%s2842_s17 + $0x8] sm:$0xff]   ;;  %v2333_v20 = vld [vmem:[%s2842_s17 + $0x10] sm:$0xff]   ;;  %p2516_p8 = scmp.ne.s32.totalorder %s3043_s8, %s2515_s12  ;;  %p3126_p9 = scmp.ne.s32.totalorder %s3110_s30, 0 }
  0xae   : > { %2036 = vmatpush3.bf16.msra.mxu0 %v2315_v2  ;;  %2056 = vmatpush3.bf16.msra.mxu1 %v2868_v6  ;;  %v2334_v21 = vld [vmem:[%s2842_s17 + $0x18] sm:$0xff]   ;;  %v2335_v22 = vld [vmem:[%s2842_s17 + $0x20] sm:$0xff]   ;;  %v2336_v23 = vld [vmem:[%s2842_s17 + $0x28] sm:$0xff]   ;;  %s2609_s22 = smov [#allocation11]  }
  0xaf   : > { %2037 = vmatprep.subr.bf16.mxu0 %v2607_v0  ;;  %2057 = vmatprep.subr.bf16.mxu1 %v2607_v0  ;;  %v2339_v24 = vld [vmem:[#allocation7 + $0x40] sm:$0xff]   ;;  %v2337_v25 = vld [vmem:[%s2842_s17 + $0x30] sm:$0xff]   ;;  %v2341_v27 = vld [vmem:[#allocation7 + $0x48] sm:$0xff]   ;;  %p2517_p10 = pnand %p2516_p8, %p3126_p9  ;;  %s2519_s3 = sshll.u32 %s2609_s22, 4  ;;  %s2520_s3 = int_to_ptr.vmem [resolvable:$false] %s2519_s3 }
  0xb0   : > { %v2340_v26 = vld [vmem:[#allocation7] sm:$0xff]   ;;  %v2342_v28 = vld [vmem:[#allocation7 + $0x8] sm:$0xff]   ;;  %v2343_v29 = vld [vmem:[#allocation7 + $0x50] sm:$0xff]   ;;  %s2521_s10 = scalar_lea.vmem %s2520_s3, 512  ;;  %p2522_p4 = scmp.lt.s32.totalorder %s3043_s8, %s2520_s3 }
  0xb1   : > { %v2344_v30 = vld [vmem:[#allocation7 + $0x10] sm:$0xff]   ;;  %v2345_v31 = vld [vmem:[#allocation7 + $0x58] sm:$0xff]   ;;  %v2347_v33 = vld [vmem:[#allocation7 + $0x60] sm:$0xff]   ;;  %p2518_p1 = pneg %p2517_p10  ;;  %p2523_p2 = scmp.lt.s32.totalorder %s2521_s10, %s2515_s12 }
  0xb2   : > { %2038 = vmatpush3.bf16.msra.mxu0 %v2316_v3  ;;  %2058 = vmatpush3.bf16.msra.mxu1 %v2873_v8  ;;  %v2346_v32 = vld [vmem:[#allocation7 + $0x18] sm:$0xff]   ;;  %v2348_v34 = vld [vmem:[#allocation7 + $0x20] sm:$0xff]   ;;  %v2349_v35 = vld [vmem:[#allocation7 + $0x68] sm:$0xff]  }
  0xb3   : > { %2039 = vmatprep.subr.bf16.mxu0 %v2607_v0  ;;  %2059 = vmatprep.subr.bf16.mxu1 %v2607_v0  ;;  %v2350_v36 = vld [vmem:[#allocation7 + $0x28] sm:$0xff]   ;;  %v2351_v37 = vld [vmem:[#allocation7 + $0x70] sm:$0xff]   ;;  %v2355_v38 = vld [vmem:[#allocation7 + $0xc0] sm:$0xff]   ;;  %p2524_p3 = por %p2523_p2, %p2522_p4 }
  0xb4   : > { %v2338_v39 = vld [vmem:[%s2842_s17 + $0x38] sm:$0xff]   ;;  %v2352_v40 = vld [vmem:[#allocation7 + $0x30] sm:$0xff]   ;;  %v2356_v41 = vld [vmem:[#allocation7 + $0x80] sm:$0xff]  }
  0xb5   : > { %v2353_v42 = vld [vmem:[#allocation7 + $0x78] sm:$0xff]   ;;  %v2357_v43 = vld [vmem:[#allocation7 + $0xc8] sm:$0xff]   ;;  %v2359_v46 = vld [vmem:[#allocation7 + $0xd0] sm:$0xff]   ;;  %p2525_p5 = pnand %p2524_p3, %p2518_p1 }
  0xb6   : > { %2040 = vmatpush3.bf16.msra.mxu0 %v2317_v5  ;;  %2060 = vmatpush3.bf16.msra.mxu1 %v2878_v10  ;;  %v2354_v44 = vld [vmem:[#allocation7 + $0x38] sm:$0xff]   ;;  %v2358_v45 = vld [vmem:[#allocation7 + $0x88] sm:$0xff]   ;;  %v2360_v47 = vld [vmem:[#allocation7 + $0x90] sm:$0xff]  }
  0xb7   : > { %2041 = vmatprep.subr.bf16.mxu0 %v2607_v0  ;;  %2061 = vmatprep.subr.bf16.mxu1 %v2607_v0  ;;  %v2361_v48 = vld [vmem:[#allocation7 + $0xd8] sm:$0xff]   ;;  %v2363_v50 = vld [vmem:[#allocation7 + $0xe0] sm:$0xff]   ;;  %v2365_v52 = vld [vmem:[#allocation7 + $0xe8] sm:$0xff]  }
  0xb8   : > { %v2362_v49 = vld [vmem:[#allocation7 + $0x98] sm:$0xff]   ;;  %v2364_v51 = vld [vmem:[#allocation7 + $0xa0] sm:$0xff]   ;;  %v2366_v53 = vld [vmem:[#allocation7 + $0xa8] sm:$0xff]  }
  0xb9   : > { %v2367_v54 = vld [vmem:[#allocation7 + $0xf0] sm:$0xff]   ;;  %v2369_v56 = vld [vmem:[#allocation7 + $0xf8] sm:$0xff]   ;;  %v2371_v57 = vld [vmem:[#allocation7 + $0x140] sm:$0xff]  }
  0xba   : > { %2042 = vmatpush3.bf16.msra.mxu0 %v2318_v7  ;;  %2062 = vmatpush3.bf16.msra.mxu1 %v2883_v12  ;;  %v2368_v55 = vld [vmem:[#allocation7 + $0xb0] sm:$0xff]   ;;  %v2370_v58 = vld [vmem:[#allocation7 + $0xb8] sm:$0xff]   ;;  %v2387_v59 = vld [vmem:[#allocation7 + $0x1c0] sm:$0xff]  }
  0xbb   : > { %2043 = vmatprep.subr.bf16.mxu0 %v2607_v0  ;;  %2063 = vmatprep.subr.bf16.mxu1 %v2607_v0 }
  0xbe   : > { %2044 = vmatpush3.bf16.msra.mxu0 %v2319_v9  ;;  %2064 = vmatpush3.bf16.msra.mxu1 %v2887_v14 }
  0xbf   : > { %2045 = vmatprep.subr.bf16.mxu0 %v2607_v0  ;;  %2065 = vmatprep.subr.bf16.mxu1 %v2607_v0 }
  0xc2   : > { %2046 = vmatpush3.bf16.msra.mxu0 %v2320_v11  ;;  %2066 = vmatpush3.bf16.msra.mxu1 %v2893_v16  ;;  %v2373_v11 = vld [vmem:[#allocation7 + $0x148] sm:$0xff]  }
  0xc3   : > { %2047 = vmatprep.subr.bf16.mxu0 %v2607_v0  ;;  %2067 = vmatprep.subr.bf16.mxu1 %v2607_v0 }
  0xc6   : > { %2048 = vmatpush3.bf16.msra.mxu0 %v2321_v13  ;;  %2068 = vmatpush3.bf16.msra.mxu1 %v2897_v17 }
  0xc7   : > { %2073 = vmatprep.subr.bf16.mxu0 %v2607_v0  ;;  %2093 = vmatprep.subr.bf16.mxu1 %v2607_v0 }
  0xc9   : > { %2050 = vmatmul.mubr.bf16.vlgmr.msra.gmra.mrb[0].mxu0 %v2323_v15  ;;  %2070 = vmatmul.mubr.bf16.vlgmr.msra.gmra.mrb[0].mxu1 %v2331_v18 }
  0xca   : > { %2074 = vmatpush3.bf16.msra.mxu0 %v2865_v4  ;;  %2089 = vmatprep.mubr.msk.bf16.mxu0 %vm2608_vm0, %v2607_v0 }
  0xcb   : > { %2075 = vmatprep.subr.bf16.mxu0 %v2607_v0  ;;  %2094 = vmatpush3.bf16.msra.mxu1 %v2865_v4 }
  0xcc   : > { %2095 = vmatprep.subr.bf16.mxu1 %v2607_v0  ;;  %2109 = vmatprep.mubr.msk.bf16.mxu1 %vm2608_vm0, %v2607_v0 }
  0xce   : > { %2076 = vmatpush3.bf16.msra.mxu0 %v2868_v6 }
  0xcf   : > { %2077 = vmatprep.subr.bf16.mxu0 %v2607_v0  ;;  %2096 = vmatpush3.bf16.msra.mxu1 %v2868_v6 }
  0xd0   : > { %2097 = vmatprep.subr.bf16.mxu1 %v2607_v0 }
  0xd2   : > { %2078 = vmatpush3.bf16.msra.mxu0 %v2873_v8 }
  0xd3   : > { %2079 = vmatprep.subr.bf16.mxu0 %v2607_v0  ;;  %2098 = vmatpush3.bf16.msra.mxu1 %v2873_v8 }
  0xd4   : > { %2099 = vmatprep.subr.bf16.mxu1 %v2607_v0 }
  0xd6   : > { %2080 = vmatpush3.bf16.msra.mxu0 %v2878_v10 }
  0xd7   : > { %2081 = vmatprep.subr.bf16.mxu0 %v2607_v0  ;;  %2100 = vmatpush3.bf16.msra.mxu1 %v2878_v10 }
  0xd8   : > { %2101 = vmatprep.subr.bf16.mxu1 %v2607_v0 }
  0xda   : > { %2082 = vmatpush3.bf16.msra.mxu0 %v2883_v12 }
  0xdb   : > { %2083 = vmatprep.subr.bf16.mxu0 %v2607_v0  ;;  %2102 = vmatpush3.bf16.msra.mxu1 %v2883_v12 }
  0xdc   : > { %2103 = vmatprep.subr.bf16.mxu1 %v2607_v0 }
  0xde   : > { %2084 = vmatpush3.bf16.msra.mxu0 %v2887_v14 }
  0xdf   : > { %2085 = vmatprep.subr.bf16.mxu0 %v2607_v0  ;;  %2104 = vmatpush3.bf16.msra.mxu1 %v2887_v14 }
  0xe0   : > { %2105 = vmatprep.subr.bf16.mxu1 %v2607_v0 }
  0xe2   : > { %2086 = vmatpush3.bf16.msra.mxu0 %v2893_v16 }
  0xe3   : > { %2087 = vmatprep.subr.bf16.mxu0 %v2607_v0  ;;  %2106 = vmatpush3.bf16.msra.mxu1 %v2893_v16 }
  0xe4   : > { %2107 = vmatprep.subr.bf16.mxu1 %v2607_v0 }
  0xe6   : > { %2088 = vmatpush3.bf16.msra.mxu0 %v2897_v17 }
  0xe7   : > { %2113 = vmatprep.subr.bf16.mxu0 %v2607_v0  ;;  %2108 = vmatpush3.bf16.msra.mxu1 %v2897_v17 }
  0xe8   : > { %2133 = vmatprep.subr.bf16.mxu1 %v2607_v0 }
  0xe9   : > { %2090 = vmatmul.mubr.bf16.vlgmr.msra.gmra.mrb[4].mxu0 %v2332_v19  ;;  %v2376_v19 = vld [vmem:[#allocation7 + $0x110] sm:$0xff]  }
  0xea   : > { %2114 = vmatpush3.bf16.msra.mxu0 %v2865_v4  ;;  %2129 = vmatprep.mubr.msk.bf16.mxu0 %vm2608_vm0, %v2607_v0 }
  0xeb   : > { %2115 = vmatprep.subr.bf16.mxu0 %v2607_v0  ;;  %2110 = vmatmul.mubr.bf16.vlgmr.msra.gmra.mrb[4].mxu1 %v2333_v20  ;;  %v2377_v20 = vld [vmem:[#allocation7 + $0x158] sm:$0xff]  }
  0xec   : > { %2134 = vmatpush3.bf16.msra.mxu1 %v2865_v4  ;;  %2149 = vmatprep.mubr.msk.bf16.mxu1 %vm2608_vm0, %v2607_v0 }
  0xed   : > { %2135 = vmatprep.subr.bf16.mxu1 %v2607_v0 }
  0xee   : > { %2116 = vmatpush3.bf16.msra.mxu0 %v2868_v6 }
  0xef   : > { %2117 = vmatprep.subr.bf16.mxu0 %v2607_v0 }
  0xf0   : > { %2136 = vmatpush3.bf16.msra.mxu1 %v2868_v6 }
  0xf1   : > { %2137 = vmatprep.subr.bf16.mxu1 %v2607_v0 }
  0xf2   : > { %2118 = vmatpush3.bf16.msra.mxu0 %v2873_v8 }
  0xf3   : > { %2119 = vmatprep.subr.bf16.mxu0 %v2607_v0 }
  0xf4   : > { %2138 = vmatpush3.bf16.msra.mxu1 %v2873_v8 }
  0xf5   : > { %2139 = vmatprep.subr.bf16.mxu1 %v2607_v0 }
  0xf6   : > { %2120 = vmatpush3.bf16.msra.mxu0 %v2878_v10 }
  0xf7   : > { %2121 = vmatprep.subr.bf16.mxu0 %v2607_v0 }
  0xf8   : > { %2140 = vmatpush3.bf16.msra.mxu1 %v2878_v10 }
  0xf9   : > { %2141 = vmatprep.subr.bf16.mxu1 %v2607_v0 }
  0xfa   : > { %2122 = vmatpush3.bf16.msra.mxu0 %v2883_v12 }
  0xfb   : > { %2123 = vmatprep.subr.bf16.mxu0 %v2607_v0 }
  0xfc   : > { %2142 = vmatpush3.bf16.msra.mxu1 %v2883_v12 }
  0xfd   : > { %2143 = vmatprep.subr.bf16.mxu1 %v2607_v0 }
  0xfe   : > { %2124 = vmatpush3.bf16.msra.mxu0 %v2887_v14 }
  0xff   : > { %2125 = vmatprep.subr.bf16.mxu0 %v2607_v0 }
 0x100   : > { %2144 = vmatpush3.bf16.msra.mxu1 %v2887_v14 }
 0x101   : > { %2145 = vmatprep.subr.bf16.mxu1 %v2607_v0 }
 0x102   : > { %2126 = vmatpush3.bf16.msra.mxu0 %v2893_v16 }
 0x103   : > { %2127 = vmatprep.subr.bf16.mxu0 %v2607_v0 }
 0x104   : > { %2146 = vmatpush3.bf16.msra.mxu1 %v2893_v16 }
 0x105   : > { %2147 = vmatprep.subr.bf16.mxu1 %v2607_v0 }
 0x106   : > { %2128 = vmatpush3.bf16.msra.mxu0 %v2897_v17 }
 0x107   : > { %2153 = vmatprep.subr.bf16.mxu0 %v2607_v0 }
 0x108   : > { %2148 = vmatpush3.bf16.msra.mxu1 %v2897_v17 }
 0x109   : > { %2130 = vmatmul.mubr.bf16.vlgmr.msra.gmra.mrb[8].mxu0 %v2334_v21  ;;  %2173 = vmatprep.subr.bf16.mxu1 %v2607_v0  ;;  %v2378_v21 = vld [vmem:[#allocation7 + $0x118] sm:$0xff]  }
 0x10a   : > { %2154 = vmatpush3.bf16.msra.mxu0 %v2865_v4  ;;  %2169 = vmatprep.mubr.msk.bf16.mxu0 %vm2608_vm0, %v2607_v0 }
 0x10b   : > { %2155 = vmatprep.subr.bf16.mxu0 %v2607_v0  ;;  %2150 = vmatmul.mubr.bf16.vlgmr.msra.gmra.mrb[8].mxu1 %v2335_v22  ;;  %v2379_v22 = vld [vmem:[#allocation7 + $0x160] sm:$0xff]  }
 0x10c   : > { %2174 = vmatpush3.bf16.msra.mxu1 %v2865_v4  ;;  %2189 = vmatprep.mubr.msk.bf16.mxu1 %vm2608_vm0, %v2607_v0 }
 0x10d   : > { %2175 = vmatprep.subr.bf16.mxu1 %v2607_v0 }
 0x10e   : > { %2156 = vmatpush3.bf16.msra.mxu0 %v2868_v6 }
 0x10f   : > { %2157 = vmatprep.subr.bf16.mxu0 %v2607_v0 }
 0x110   : > { %2176 = vmatpush3.bf16.msra.mxu1 %v2868_v6 }
 0x111   : > { %2177 = vmatprep.subr.bf16.mxu1 %v2607_v0 }
 0x112   : > { %2158 = vmatpush3.bf16.msra.mxu0 %v2873_v8 }
 0x113   : > { %2159 = vmatprep.subr.bf16.mxu0 %v2607_v0 }
 0x114   : > { %2178 = vmatpush3.bf16.msra.mxu1 %v2873_v8 }
 0x115   : > { %2179 = vmatprep.subr.bf16.mxu1 %v2607_v0 }
 0x116   : > { %2160 = vmatpush3.bf16.msra.mxu0 %v2878_v10 }
 0x117   : > { %2161 = vmatprep.subr.bf16.mxu0 %v2607_v0 }
 0x118   : > { %2180 = vmatpush3.bf16.msra.mxu1 %v2878_v10 }
 0x119   : > { %2181 = vmatprep.subr.bf16.mxu1 %v2607_v0 }
 0x11a   : > { %2162 = vmatpush3.bf16.msra.mxu0 %v2883_v12 }
 0x11b   : > { %2163 = vmatprep.subr.bf16.mxu0 %v2607_v0 }
 0x11c   : > { %2182 = vmatpush3.bf16.msra.mxu1 %v2883_v12 }
 0x11d   : > { %2183 = vmatprep.subr.bf16.mxu1 %v2607_v0 }
 0x11e   : > { %2164 = vmatpush3.bf16.msra.mxu0 %v2887_v14 }
 0x11f   : > { %2165 = vmatprep.subr.bf16.mxu0 %v2607_v0 }
 0x120   : > { %2184 = vmatpush3.bf16.msra.mxu1 %v2887_v14 }
 0x121   : > { %2185 = vmatprep.subr.bf16.mxu1 %v2607_v0 }
 0x122   : > { %2166 = vmatpush3.bf16.msra.mxu0 %v2893_v16 }
 0x123   : > { %2167 = vmatprep.subr.bf16.mxu0 %v2607_v0 }
 0x124   : > { %2186 = vmatpush3.bf16.msra.mxu1 %v2893_v16 }
 0x125   : > { %2187 = vmatprep.subr.bf16.mxu1 %v2607_v0 }
 0x126   : > { %2168 = vmatpush3.bf16.msra.mxu0 %v2897_v17 }
 0x127   : > { %2193 = vmatprep.subr.bf16.mxu0 %v2607_v0 }
 0x128   : > { %2188 = vmatpush3.bf16.msra.mxu1 %v2897_v17 }
 0x129   : > { %2170 = vmatmul.mubr.bf16.vlgmr.msra.gmra.mrb[12].mxu0 %v2336_v23  ;;  %1945 = vmatprep.subr.bf16.mxu1 %v2339_v24  ;;  %v2380_v23 = vld [vmem:[#allocation7 + $0x120] sm:$0xff]   ;;  %v2381_v24 = vld [vmem:[#allocation7 + $0x168] sm:$0xff]  }
 0x12a   : > { %2194 = vmatpush3.bf16.msra.mxu0 %v2865_v4  ;;  %2209 = vmatprep.mubr.msk.bf16.mxu0 %vm2608_vm0, %v2607_v0 }
 0x12b   : > { %2195 = vmatprep.subr.bf16.mxu0 %v2607_v0  ;;  %2190 = vmatmul.mubr.bf16.vlgmr.msra.gmra.mrb[12].mxu1 %v2337_v25  ;;  %v2382_v25 = vld [vmem:[#allocation7 + $0x128] sm:$0xff]  }
 0x12c   : > { %1946 = vmatpush3.bf16.msra.mxu1 %v2340_v26  ;;  %v2383_v26 = vld [vmem:[#allocation7 + $0x170] sm:$0xff]  }
 0x12d   : > { %1947 = vmatprep.subr.bf16.mxu1 %v2341_v27  ;;  %v2384_v27 = vld [vmem:[#allocation7 + $0x130] sm:$0xff]  }
 0x12e   : > { %2196 = vmatpush3.bf16.msra.mxu0 %v2868_v6 }
 0x12f   : > { %2197 = vmatprep.subr.bf16.mxu0 %v2607_v0 }
 0x130   : > { %1948 = vmatpush3.bf16.msra.mxu1 %v2342_v28  ;;  %v2385_v28 = vld [vmem:[#allocation7 + $0x178] sm:$0xff]  }
 0x131   : > { %1949 = vmatprep.subr.bf16.mxu1 %v2343_v29  ;;  %v2386_v29 = vld [vmem:[#allocation7 + $0x138] sm:$0xff]  }
 0x132   : > { %2198 = vmatpush3.bf16.msra.mxu0 %v2873_v8 }
 0x133   : > { %2199 = vmatprep.subr.bf16.mxu0 %v2607_v0 }
 0x134   : > { %1950 = vmatpush3.bf16.msra.mxu1 %v2344_v30 }
 0x135   : > { %1951 = vmatprep.subr.bf16.mxu1 %v2345_v31 }
 0x136   : > { %2200 = vmatpush3.bf16.msra.mxu0 %v2878_v10  ;;  %v2372_v10 = vld [vmem:[#allocation7 + $0x100] sm:$0xff]  }
 0x137   : > { %2201 = vmatprep.subr.bf16.mxu0 %v2607_v0 }
 0x138   : > { %1952 = vmatpush3.bf16.msra.mxu1 %v2346_v32 }
 0x139   : > { %1953 = vmatprep.subr.bf16.mxu1 %v2347_v33 }
 0x13a   : > { %2202 = vmatpush3.bf16.msra.mxu0 %v2883_v12  ;;  %v2374_v12 = vld [vmem:[#allocation7 + $0x108] sm:$0xff]  }
 0x13b   : > { %2203 = vmatprep.subr.bf16.mxu0 %v2607_v0 }
 0x13c   : > { %1954 = vmatpush3.bf16.msra.mxu1 %v2348_v34 }
 0x13d   : > { %1955 = vmatprep.subr.bf16.mxu1 %v2349_v35  ;;  %v2388_v35 = vld [vmem:[#allocation7 + $0x180] sm:$0xff]  }
 0x13e   : > { %2204 = vmatpush3.bf16.msra.mxu0 %v2887_v14  ;;  %v2375_v14 = vld [vmem:[#allocation7 + $0x150] sm:$0xff]  }
 0x13f   : > { %2205 = vmatprep.subr.bf16.mxu0 %v2607_v0 }
 0x140   : > { %1956 = vmatpush3.bf16.msra.mxu1 %v2350_v36  ;;  %v2389_v36 = vld [vmem:[#allocation7 + $0x1c8] sm:$0xff]  }
 0x141   : > { %1957 = vmatprep.subr.bf16.mxu1 %v2351_v37  ;;  %v2390_v37 = vld [vmem:[#allocation7 + $0x188] sm:$0xff]  }
 0x142   : > { %2206 = vmatpush3.bf16.msra.mxu0 %v2893_v16 }
 0x143   : > { %2207 = vmatprep.subr.bf16.mxu0 %v2607_v0 }
 0x144   : > { %1958 = vmatpush3.bf16.msra.mxu1 %v2352_v40 }
 0x145   : > { %1959 = vmatprep.subr.bf16.mxu1 %v2353_v42 }
 0x146   : > { %2208 = vmatpush3.bf16.msra.mxu0 %v2897_v17 }
 0x147   : > { %1967 = vmatprep.subr.bf16.mxu0 %v2355_v38 }
 0x148   : > { %1960 = vmatpush3.bf16.msra.mxu1 %v2354_v44  ;;  %v2392_v44 = vld [vmem:[#allocation7 + $0x190] sm:$0xff]  }
 0x149   : > { %2210 = vmatmul.mubr.bf16.vlgmr.msra.gmra.mrb[16].mxu0 %v2338_v39  ;;  %1989 = vmatprep.subr.bf16.mxu1 %v2371_v57  ;;  %v2391_v39 = vld [vmem:[#allocation7 + $0x1d0] sm:$0xff]  }
 0x14a   : > { %1968 = vmatpush3.bf16.msra.mxu0 %v2356_v41 }
 0x14b   : > { %1969 = vmatprep.subr.bf16.mxu0 %v2357_v43 }
 0x14e   : > { %1970 = vmatpush3.bf16.msra.mxu0 %v2358_v45  ;;  %v2393_v45 = vld [vmem:[#allocation7 + $0x1d8] sm:$0xff]  }
 0x14f   : > { %1971 = vmatprep.subr.bf16.mxu0 %v2359_v46  ;;  %v2394_v46 = vld [vmem:[#allocation7 + $0x198] sm:$0xff]  }
 0x152   : > { %1972 = vmatpush3.bf16.msra.mxu0 %v2360_v47  ;;  %v2395_v47 = vld [vmem:[#allocation7 + $0x1e0] sm:$0xff]  }
 0x153   : > { %1973 = vmatprep.subr.bf16.mxu0 %v2361_v48  ;;  %v2396_v48 = vld [vmem:[#allocation7 + $0x1a0] sm:$0xff]  }
 0x156   : > { %1974 = vmatpush3.bf16.msra.mxu0 %v2362_v49  ;;  %v2397_v49 = vld [vmem:[#allocation7 + $0x1e8] sm:$0xff]  }
 0x157   : > { %1975 = vmatprep.subr.bf16.mxu0 %v2363_v50  ;;  %v2398_v50 = vld [vmem:[#allocation7 + $0x1a8] sm:$0xff]  }
 0x15a   : > { %1976 = vmatpush3.bf16.msra.mxu0 %v2364_v51  ;;  %v2399_v51 = vld [vmem:[#allocation7 + $0x1f0] sm:$0xff]  }
 0x15b   : > { %1977 = vmatprep.subr.bf16.mxu0 %v2365_v52  ;;  %v2400_v52 = vld [vmem:[#allocation7 + $0x1b0] sm:$0xff]  }
 0x15e   : > { %1978 = vmatpush3.bf16.msra.mxu0 %v2366_v53  ;;  %v2401_v53 = vld [vmem:[#allocation7 + $0x1f8] sm:$0xff]  }
 0x15f   : > { %1979 = vmatprep.subr.bf16.mxu0 %v2367_v54  ;;  %v2402_v54 = vld [vmem:[#allocation7 + $0x1b8] sm:$0xff]  }
 0x162   : > { %1980 = vmatpush3.bf16.msra.mxu0 %v2368_v55 }
 0x163   : > { %1981 = vmatprep.subr.bf16.mxu0 %v2369_v56 }
 0x166   : > { %1982 = vmatpush3.bf16.msra.mxu0 %v2370_v58 }
 0x167   : > { %2011 = vmatprep.subr.bf16.mxu0 %v2387_v59 }
 0x19c   : > { %v3035_v60 = vpop.f32.mrb[0].mxu0  ;;  %v558_v0 = vpop.f32.mrb[0].mxu1 }
 0x19d   : > { %v2051_v61 = vpop.f32.mrb[1].mxu0  ;;  %v2071_v1 = vpop.f32.mrb[1].mxu1 }
 0x19e   : > { %v3037_v62 = vpop.f32.mrb[2].mxu0  ;;  %v561_v2 = vpop.f32.mrb[2].mxu1 }
 0x19f   : > { %v2052_v63 = vpop.f32.mrb[3].mxu0  ;;  %v565_v3 = vpack.c.bf16 %v561_v2, %v558_v0  ;;  %v2072_v4 = vpop.f32.mrb[3].mxu1 }
 0x1bc   : > { %v609_v5 = vpop.f32.mrb[4].mxu0 }
 0x1bd   : > { %v2091_v6 = vpop.f32.mrb[5].mxu0 }
 0x1be   : > { %v612_v7 = vpop.f32.mrb[6].mxu0  ;;  %v660_v13 = vpop.f32.mrb[4].mxu1 }
 0x1bf   : > { %v616_v8 = vpack.c.bf16 %v612_v7, %v609_v5  ;;  %v2092_v9 = vpop.f32.mrb[7].mxu0  ;;  %v2111_v15 = vpop.f32.mrb[5].mxu1 }
 0x1c0   : > { %v663_v16 = vpop.f32.mrb[6].mxu1 }
 0x1c1   : > { %1467 = vmatprep.mubr.bf16.mxu1 %v616_v8  ;;  %v667_v17 = vpack.c.bf16 %v663_v16, %v660_v13  ;;  %v2112_v18 = vpop.f32.mrb[7].mxu1 }
 0x1c2   : > { %1468 = vmatmul.mubr.bf16.vlgmr.msra.gmra.mrb[16].mxu1 %v565_v3 }
 0x1c3   : > { %1990 = vmatpush3.bf16.msra.mxu1 %v2372_v10 }
 0x1c4   : > { %1991 = vmatprep.subr.bf16.mxu1 %v2373_v11 }
 0x1c7   : > { %1992 = vmatpush3.bf16.msra.mxu1 %v2374_v12 }
 0x1c8   : > { %1993 = vmatprep.subr.bf16.mxu1 %v2375_v14 }
 0x1cb   : > { %1994 = vmatpush3.bf16.msra.mxu1 %v2376_v19 }
 0x1cc   : > { %1995 = vmatprep.subr.bf16.mxu1 %v2377_v20 }
 0x1cf   : > { %1996 = vmatpush3.bf16.msra.mxu1 %v2378_v21 }
 0x1d0   : > { %1997 = vmatprep.subr.bf16.mxu1 %v2379_v22 }
 0x1d3   : > { %1998 = vmatpush3.bf16.msra.mxu1 %v2380_v23 }
 0x1d4   : > { %1999 = vmatprep.subr.bf16.mxu1 %v2381_v24 }
 0x1d7   : > { %2000 = vmatpush3.bf16.msra.mxu1 %v2382_v25 }
 0x1d8   : > { %2001 = vmatprep.subr.bf16.mxu1 %v2383_v26 }
 0x1db   : > { %2002 = vmatpush3.bf16.msra.mxu1 %v2384_v27 }
 0x1dc   : > { %v711_v30 = vpop.f32.mrb[8].mxu0  ;;  %2003 = vmatprep.subr.bf16.mxu1 %v2385_v28 }
 0x1dd   : > { %v2131_v31 = vpop.f32.mrb[9].mxu0 }
 0x1de   : > { %v714_v32 = vpop.f32.mrb[10].mxu0  ;;  %v762_v38 = vpop.f32.mrb[8].mxu1  ;;  %v1753_v31 = vld [vmem:[#allocation10] ss:$0 sm:$0xff] }
 0x1df   : > { %v718_v33 = vpack.c.bf16 %v714_v32, %v711_v30  ;;  %v2132_v34 = vpop.f32.mrb[11].mxu0  ;;  %2004 = vmatpush3.bf16.msra.mxu1 %v2386_v29  ;;  %v2151_v40 = vpop.f32.mrb[9].mxu1 }
 0x1e0   : > { %v765_v41 = vpop.f32.mrb[10].mxu1 }
 0x1e1   : > { %1508 = vmatprep.mubr.bf16.mxu0 %v718_v33  ;;  %v769_v42 = vpack.c.bf16 %v765_v41, %v762_v38  ;;  %v2152_v43 = vpop.f32.mrb[11].mxu1 }
 0x1e2   : > { %1509 = vmatmul.mubr.bf16.vlgmr.msra.gmra.mrb[20].mxu0 %v667_v17 }
 0x1e3   : > { %2012 = vmatpush3.bf16.msra.mxu0 %v2388_v35 }
 0x1e4   : > { %2013 = vmatprep.subr.bf16.mxu0 %v2389_v36  ;;  %v462_v36 = vadd.f32 %v1753_v31, %v3035_v60 }
 0x1e7   : > { %2014 = vmatpush3.bf16.msra.mxu0 %v2390_v37 }
 0x1e8   : > { %2015 = vmatprep.subr.bf16.mxu0 %v2391_v39  ;;  %v465_v39 = vadd.f32 %v1753_v31, %v3037_v62 }
 0x1eb   : > { %2016 = vmatpush3.bf16.msra.mxu0 %v2392_v44 }
 0x1ec   : > { %2017 = vmatprep.subr.bf16.mxu0 %v2393_v45 }
 0x1ef   : > { %2018 = vmatpush3.bf16.msra.mxu0 %v2394_v46 }
 0x1f0   : > { %2019 = vmatprep.subr.bf16.mxu0 %v2395_v47 }
 0x1f3   : > { %2020 = vmatpush3.bf16.msra.mxu0 %v2396_v48 }
 0x1f4   : > { %2021 = vmatprep.subr.bf16.mxu0 %v2397_v49 }
 0x1f7   : > { %2022 = vmatpush3.bf16.msra.mxu0 %v2398_v50 }
 0x1f8   : > { %2023 = vmatprep.subr.bf16.mxu0 %v2399_v51 }
 0x1fb   : > { %2024 = vmatpush3.bf16.msra.mxu0 %v2400_v52 }
 0x1fc   : > { %v813_v55 = vpop.f32.mrb[12].mxu0  ;;  %2025 = vmatprep.subr.bf16.mxu0 %v2401_v53 }
 0x1fd   : > { %v2171_v56 = vpop.f32.mrb[13].mxu0 }
 0x1fe   : > { %v816_v57 = vpop.f32.mrb[14].mxu0  ;;  %v864_v61 = vpop.f32.mrb[12].mxu1 }
 0x1ff   : > { %v820_v58 = vpack.c.bf16 %v816_v57, %v813_v55  ;;  %v2172_v59 = vpop.f32.mrb[15].mxu0  ;;  %2026 = vmatpush3.bf16.msra.mxu0 %v2402_v54  ;;  %v2191_v63 = vpop.f32.mrb[13].mxu1 }
 0x200   : > { %v867_v0 = vpop.f32.mrb[14].mxu1 }
 0x201   : > { %1549 = vmatprep.mubr.bf16.mxu1 %v820_v58  ;;  %v871_v1 = vpack.c.bf16 %v867_v0, %v864_v61  ;;  %v2192_v2 = vpop.f32.mrb[15].mxu1 }
 0x202   : > { %1550 = vmatmul.mubr.bf16.vlgmr.msra.gmra.mrb[20].mxu1 %v769_v42 }
 0x21c   : > { %v915_v3 = vpop.f32.mrb[16].mxu0 }
 0x21d   : > { %v2211_v4 = vpop.f32.mrb[17].mxu0 }
 0x21e   : > { %v918_v5 = vpop.f32.mrb[18].mxu0 }
 0x21f   : > { %v922_v6 = vpack.c.bf16 %v918_v5, %v915_v3  ;;  %v2212_v7 = vpop.f32.mrb[19].mxu0 }
 0x221   : > { %1590 = vmatprep.mubr.bf16.mxu0 %v922_v6 }
 0x222   : > { %1591 = vmatmul.mubr.bf16.vlgmr.msra.gmra.mrb[24].mxu0 %v871_v1 }
 0x295   : > { %v1961_v8 = vpop.f32.mrb[16].mxu1 }
 0x296   : > { %v1962_v9 = vpop.f32.mrb[17].mxu1 }
 0x297   : > { %v1963_v10 = vadd.f32 %v1962_v9, %v1961_v8  ;;  %v1964_v11 = vpop.f32.mrb[18].mxu1 }
 0x298   : > { %v1965_v12 = vpop.f32.mrb[19].mxu1 }
 0x299   : > { %v1966_v13 = vadd.f32 %v1965_v12, %v1964_v11 }
 0x2b5   : > { %v1983_v14 = vpop.f32.mrb[20].mxu0 }
 0x2b6   : > { %v1984_v15 = vpop.f32.mrb[21].mxu0 }
 0x2b7   : > { %v1985_v16 = vadd.f32 %v1984_v15, %v1983_v14  ;;  %v1986_v17 = vpop.f32.mrb[22].mxu0 }
 0x2b8   : > { %v1987_v18 = vpop.f32.mrb[23].mxu0 }
 0x2b9   : > { %v1511_v19 = vadd.f32 %v1985_v16, %v1963_v10  ;;  %v1988_v20 = vadd.f32 %v1987_v18, %v1986_v17 }
 0x2bb   : > { %v1514_v21 = vadd.f32 %v1988_v20, %v1966_v13 }
 0x2d5   : > { %v2005_v22 = vpop.f32.mrb[20].mxu1 }
 0x2d6   : > { %v2006_v23 = vpop.f32.mrb[21].mxu1 }
 0x2d7   : > { %v2007_v24 = vadd.f32 %v2006_v23, %v2005_v22  ;;  %v2008_v25 = vpop.f32.mrb[22].mxu1 }
 0x2d8   : > { %v2009_v26 = vpop.f32.mrb[23].mxu1 }
 0x2d9   : > { %v1552_v27 = vadd.f32 %v2007_v24, %v1511_v19  ;;  %v2010_v28 = vadd.f32 %v2009_v26, %v2008_v25 }
 0x2db   : > { %v1555_v29 = vadd.f32 %v2010_v28, %v1514_v21 }
 0x2f5   : > { %v2027_v30 = vpop.f32.mrb[24].mxu0 }
 0x2f6   : > { %v2028_v32 = vpop.f32.mrb[25].mxu0 }
 0x2f7   : > { %v2029_v33 = vadd.f32 %v2028_v32, %v2027_v30  ;;  %v2030_v34 = vpop.f32.mrb[26].mxu0 }
 0x2f8   : > { %v2031_v35 = vpop.f32.mrb[27].mxu0 }
 0x2f9   : > { %v1593_v37 = vadd.f32 %v2029_v33, %v1552_v27  ;;  %v2032_v38 = vadd.f32 %v2031_v35, %v2030_v34 }
 0x2fb   : > { %v1599_v40 = vadd.f32 %v1593_v37, %v462_v36  ;;  %v1596_v41 = vadd.f32 %v2032_v38, %v1555_v29 }
 0x2fd   : > { %1601 = vst [vmem:[%s323_s26] sm:$0xff] %v1599_v40  ;;  %v1600_v42 = vadd.f32 %v1596_v41, %v465_v39 }
 0x2ff   : > { %1602 = vst [vmem:[%s323_s26 + $0x8] sm:$0xff] %v1600_v42 }
 0x300   : > { %2528 = shalt.err (!%p2525_p5)
}
 0x301   : > { %s2529_s6 = scalar_lea.hbm %s3048_s13, 256  ;;  %s2533_s17 = scalar_lea.hbm %s3096_s5, 768 }
 0x302   : > { %p2530_p6 = scmp.ne.s32.totalorder %s3048_s13, %s2529_s6  ;;  %p2534_p13 = scmp.lt.u32.totalorder %s3048_s13, %s3096_s5 }
 0x303   : > { %p2535_p0 = scmp.lt.u32.totalorder %s2533_s17, %s2529_s6  ;;  %p2537_p8 = scmp.lt.u32.totalorder %s2529_s6, %s3048_s13 }
 0x304   : > { %p2531_p11 = pnand %p2530_p6, %p3126_p9 }
 0x305   : > { %p2536_p7 = por %p2535_p0, %p2534_p13 }
 0x306   : > { %p2532_p12 = pneg %p2531_p11 }
 0x307   : > { %p2538_p10 = por %p2537_p8, %p2536_p7 }
 0x309   : > { %p2539_p1 = pnand %p2538_p10, %p2532_p12 }
 0x30b   : > { %2542 = shalt.err (!%p2539_p1)
}
 0x30c   : > { %s2610_s14 = smov 128   ;;  %s2611_s16 = smov 8  }
 0x30d   : > { %2238 = dma.vmem_to_hbm [thread:$0]  (%p3126_p9), %s3043_s8, 256, %s3048_s13, %s1604_s15, %s2610_s14, %s2610_s14, %s2611_s16  }
 0x30e PF: > { %s3127_s25 = sld [smem:[#allocation22_spill]]  ;;  %p2265_p4 = scmp.ge.s32.totalorder %s2593_s21, 2 }
 0x30f   : > { %s1632_s26 = sand.u32 1, %s2581_s18  }
 0x310   : > { %s1633_s9 = scalar_lea.sflag [#allocation4], %s1632_s26 }
 0x314   : > { %p3128_p2 = scmp.ne.s32.totalorder %s3127_s25, 0 }
 0x316   : > { %p2254_p3 = pnand %p2265_p4, %p3128_p2 }
 0x318   : > { %2576 = dma.done.wait (!%p2254_p3), %s1633_s9, 256  }
 0x319   : > { %2578 = vsyncadd (!%p2254_p3), %s1633_s9, 4294967040  ;;  %s3129_s21 = sld [smem:[#allocation20_spill]]  ;;  %s3130_s24 = sld [smem:[#allocation21_spill]] }
 0x31a   : > { %s3131_s18 = smov %s2585_s19  ;;  %s3132_s19 = smov %s2589_s20 }
 0x31f   : > { %p20_p5 = scmp.ge.s32.totalorder %s3129_s21, 5   ;;  %s3133_s20 = smov %s3130_s24 }
 0x321   :  { %22 = sbr.rel (!%p20_p5) target bundleno = 9 (0x9), region = 115 }
 0x328   :  { %1638 = vsyncpa [#allocation3], 1 }
 0x329   :  { %1640 = vsyncpa [#allocation3 + $0x1], 1 }
 0x32a   :  { %1641 = vsyncpa [#allocation6], 1 }
 0x32b   :  { %1643 = vsyncpa [#allocation6 + $0x1], 1 }
 0x32c   :  { %1644 = vsyncpa [#allocation9], 1 }
 0x32d   :  { %1645 = vsyncpa [#allocation4], 1 }
 0x32e   :  { %1647 = vsyncpa [#allocation4 + $0x1], 1 }

</bundles_post_ra>
